<compile_context>
chip_gen: v7x
topology: tpu7x:2x2x1
jax: 0.10.0
libtpu: 0.0.40
codegen_flags: <defaults>
</compile_context>

<pallas_src>
import functools

import jax
import jax.numpy as jnp
from jax.experimental import pallas as pl
from jax.experimental.pallas import tpu as pltpu


def _round_up(n, m):
    return ((n + m - 1) // m) * m


def _default_act_dtype():
    """bf16 elementwise on chips with a native bf16 VALU (v6e/v7x), else f32."""
    try:
        kind = jax.devices()[0].device_kind.lower()
    except Exception:
        return jnp.float32
    if "v6" in kind or "v7" in kind:
        return jnp.bfloat16
    return jnp.float32          # v5e/v5p (no bf16 VALU) and unknown backends


def zdisc_kernel(x_ref, w1_ref, b1_ref, w2_ref, b2_ref, w3r_ref, b3_ref, o_ref,
                 *, act_dtype):
    # Layer 1: MXU matmul (bf16 operands, f32 accumulate), then bias + leaky
    # ReLU in act_dtype (bf16 on v6e/v7x, f32 on v5e).
    xb = x_ref[...].astype(jnp.bfloat16)
    h = jnp.dot(xb, w1_ref[...], preferred_element_type=jnp.float32)
    h = h.astype(act_dtype) + b1_ref[...]
    h = jnp.maximum(h, 0.2 * h)                 # leaky_relu(0.2): 2 VALU ops/vreg

    # Layer 2: same pattern (the astype is a no-op when act_dtype is bf16).
    h = jnp.dot(h.astype(jnp.bfloat16), w2_ref[...],
                preferred_element_type=jnp.float32)
    h = h.astype(act_dtype) + b2_ref[...]
    h = jnp.maximum(h, 0.2 * h)

    # Layer 3 (d -> 1): run on the VPU (elementwise mul) + XLU (lane reduce) in
    # f32 instead of an N=1 MXU matmul.  b3 is a scalar in SMEM.
    y = jnp.sum(h.astype(jnp.float32) * w3r_ref[...], axis=-1, keepdims=True)
    y = y + b3_ref[0, 0]

    # Layer 3 activation: sigmoid (EUP).
    o_ref[...] = jax.nn.sigmoid(y)


def z_discriminator(x, w1, b1, w2, b2, w3, b3, *, tile_b=8192,
                    act_dtype=None, vmem_limit_bytes=None):
    """x: (B, z_size) f32.  Weights (in, out) f32, biases broadcastable to (1, out).

    Returns (B, 1) f32 = sigmoid(lrelu_.2(lrelu_.2(x@w1+b1)@w2+b2)@w3+b3).
    """
    B, z_size = x.shape
    d = w1.shape[1]

    if act_dtype is None:
        act_dtype = _default_act_dtype()

    # Batch tile: multiple of 8 (sublane), clamped for small B, and capped so the
    # grid keeps >= 2 steps (v7x dual-TC sharding; near-free on v5e/v6e).
    tb = min(tile_b, _round_up(B, 8), _round_up(pl.cdiv(B, 2), 8))
    tb = max(tb, 8)
    grid = (pl.cdiv(B, tb),)

    # Resident operands (constant index_maps -> DMA'd once, stay in VMEM):
    # matmul weights in bf16, biases in act_dtype, VPU-path w3 row + b3 in f32.
    w1b = w1.astype(jnp.bfloat16)
    w2b = w2.astype(jnp.bfloat16)
    b1a = b1.reshape(1, d).astype(act_dtype)
    b2a = b2.reshape(1, d).astype(act_dtype)
    w3r = w3.reshape(1, d).astype(jnp.float32)     # (d, 1) -> (1, d) row
    b3s = b3.reshape(1, 1).astype(jnp.float32)

    resident = lambda shape: pl.BlockSpec(shape, lambda i: (0, 0))

    kernel = functools.partial(zdisc_kernel, act_dtype=act_dtype)

    return pl.pallas_call(
        kernel,
        out_shape=jax.ShapeDtypeStruct((B, 1), jnp.float32),
        grid=grid,
        in_specs=[
            pl.BlockSpec((tb, z_size), lambda i: (i, 0)),       # x: streamed tiles
            resident((z_size, d)),                              # w1 (bf16, resident)
            resident((1, d)),                                   # b1 (act_dtype)
            resident((d, d)),                                   # w2 (bf16, resident)
            resident((1, d)),                                   # b2 (act_dtype)
            resident((1, d)),                                   # w3 row (f32, VPU path)
            pl.BlockSpec(memory_space=pltpu.MemorySpace.SMEM),  # b3 scalar in SMEM
        ],
        out_specs=pl.BlockSpec((tb, 1), lambda i: (i, 0)),
        compiler_params=pltpu.CompilerParams(
            dimension_semantics=("parallel",),      # v7x dual-TC batch sharding
            vmem_limit_bytes=vmem_limit_bytes,      # only needed for tile_b sweeps >16K
        ),
    )(x, w1b, b1a, w2b, b2a, w3r, b3s)


def init_params(key, z_size, d, std=0.02):
    """Deterministic normal(0, std) weights, zero biases (mirrors normal_init)."""
    k1, k2, k3 = jax.random.split(key, 3)
    w1 = std * jax.random.normal(k1, (z_size, d), jnp.float32)
    b1 = jnp.zeros((1, d), jnp.float32)
    w2 = std * jax.random.normal(k2, (d, d), jnp.float32)
    b2 = jnp.zeros((1, d), jnp.float32)
    w3 = std * jax.random.normal(k3, (d, 1), jnp.float32)
    b3 = jnp.zeros((1, 1), jnp.float32)
    return w1, b1, w2, b2, w3, b3


def reference(x, w1, b1, w2, b2, w3, b3):
    lrelu = lambda v: jnp.where(v > 0, v, 0.2 * v)
    h = lrelu(x @ w1 + b1)
    h = lrelu(h @ w2 + b2)
    return jax.nn.sigmoid(h @ w3 + b3)


if __name__ == "__main__":
    key = jax.random.PRNGKey(0)
    k_x, k_p, k_x2 = jax.random.split(key, 3)

    z_size, d = 32, 128
    params = init_params(k_p, z_size, d)

    # Small batch (single grid step).
    x_small = jax.random.normal(k_x, (8, z_size), jnp.float32)
    out_small = jax.block_until_ready(z_discriminator(x_small, *params))
    ref_small = reference(x_small, *params)
    assert out_small.shape == (8, 1)
    # bf16 MXU operands / bf16 elementwise (f32 accumulation) -> loose tolerance
    # vs the f32 reference.
    assert jnp.allclose(out_small, ref_small, atol=1e-2, rtol=1e-2)

    # Ragged batch (B not a multiple of 8 or the tile) -> exercises grid > 1 and
    # the padded last tile whose OOB output rows Pallas discards.
    x_ragged = jax.random.normal(k_x2, (300, z_size), jnp.float32)
    out_ragged = jax.block_until_ready(z_discriminator(x_ragged, *params))
    ref_ragged = reference(x_ragged, *params)
    assert out_ragged.shape == (300, 1)
    assert jnp.allclose(out_ragged, ref_ragged, atol=1e-2, rtol=1e-2)

    print("KERNEL_OK")
</pallas_src>

<mosaic_0001>
module attributes {stable_mosaic.version = 11 : i64} {
  func.func @zdisc_kernel(%arg0: i32, %arg1: memref<8x32xf32, #tpu.memory_space<vmem>>, %arg2: memref<32x128xbf16, #tpu.memory_space<vmem>>, %arg3: memref<1x128xf32, #tpu.memory_space<vmem>>, %arg4: memref<128x128xbf16, #tpu.memory_space<vmem>>, %arg5: memref<1x128xf32, #tpu.memory_space<vmem>>, %arg6: memref<1x128xf32, #tpu.memory_space<vmem>>, %arg7: memref<1x1xf32, #tpu.memory_space<smem>>, %arg8: memref<8x1xf32, #tpu.memory_space<vmem>>) attributes {dimension_semantics = [#tpu.dimension_semantics<parallel>], iteration_bounds = array<i64: 1>, scalar_prefetch = 0 : i64, scratch_operands = 0 : i64, tpu.core_type = #tpu.core_type<tc>, window_params = [{transform_indices = @transform_0, window_bounds = array<i64: 8, 32>}, {pipeline_mode = #tpu.pipeline_mode<synchronous>, transform_indices = @transform_1, window_bounds = array<i64: 32, 128>}, {pipeline_mode = #tpu.pipeline_mode<synchronous>, transform_indices = @transform_2, window_bounds = array<i64: 1, 128>}, {pipeline_mode = #tpu.pipeline_mode<synchronous>, transform_indices = @transform_3, window_bounds = array<i64: 128, 128>}, {pipeline_mode = #tpu.pipeline_mode<synchronous>, transform_indices = @transform_4, window_bounds = array<i64: 1, 128>}, {pipeline_mode = #tpu.pipeline_mode<synchronous>, transform_indices = @transform_5, window_bounds = array<i64: 1, 128>}, {transform_indices = @transform_6, window_bounds = array<i64: 1, 1>}, {transform_indices = @transform_7, window_bounds = array<i64: 8, 1>}]} {
    %c0 = arith.constant 0 : index
    %c0_0 = arith.constant 0 : index
    %0 = vector.load %arg1[%c0, %c0_0] : memref<8x32xf32, #tpu.memory_space<vmem>>, vector<8x32xf32>
    %1 = arith.truncf %0 : vector<8x32xf32> to vector<8x32xbf16>
    %c0_1 = arith.constant 0 : index
    %c0_2 = arith.constant 0 : index
    %2 = vector.load %arg2[%c0_1, %c0_2] : memref<32x128xbf16, #tpu.memory_space<vmem>>, vector<32x128xbf16>
    %cst = arith.constant dense<0.000000e+00> : vector<8x128xf32>
    %3 = tpu.matmul %1, %2, %cst {dimension_numbers = #tpu.dot_dimension_numbers<[1], [0], [0], [1], [0, 0, 1, 1], [], []>} : vector<8x32xbf16>, vector<32x128xbf16>, vector<8x128xf32> -> vector<8x128xf32>
    %c0_3 = arith.constant 0 : index
    %c0_4 = arith.constant 0 : index
    %4 = vector.load %arg3[%c0_3, %c0_4] : memref<1x128xf32, #tpu.memory_space<vmem>>, vector<1x128xf32>
    %5 = vector.broadcast %4 : vector<1x128xf32> to vector<8x128xf32>
    %6 = arith.addf %3, %5 : vector<8x128xf32>
    %cst_5 = arith.constant 2.000000e-01 : f32
    %7 = vector.broadcast %cst_5 : f32 to vector<8x128xf32>
    %8 = arith.mulf %7, %6 : vector<8x128xf32>
    %9 = arith.maximumf %6, %8 : vector<8x128xf32>
    %10 = arith.truncf %9 : vector<8x128xf32> to vector<8x128xbf16>
    %c0_6 = arith.constant 0 : index
    %c0_7 = arith.constant 0 : index
    %11 = vector.load %arg4[%c0_6, %c0_7] : memref<128x128xbf16, #tpu.memory_space<vmem>>, vector<128x128xbf16>
    %cst_8 = arith.constant dense<0.000000e+00> : vector<8x128xf32>
    %12 = tpu.matmul %10, %11, %cst_8 {dimension_numbers = #tpu.dot_dimension_numbers<[1], [0], [0], [1], [0, 0, 1, 1], [], []>} : vector<8x128xbf16>, vector<128x128xbf16>, vector<8x128xf32> -> vector<8x128xf32>
    %c0_9 = arith.constant 0 : index
    %c0_10 = arith.constant 0 : index
    %13 = vector.load %arg5[%c0_9, %c0_10] : memref<1x128xf32, #tpu.memory_space<vmem>>, vector<1x128xf32>
    %14 = vector.broadcast %13 : vector<1x128xf32> to vector<8x128xf32>
    %15 = arith.addf %12, %14 : vector<8x128xf32>
    %cst_11 = arith.constant 2.000000e-01 : f32
    %16 = vector.broadcast %cst_11 : f32 to vector<8x128xf32>
    %17 = arith.mulf %16, %15 : vector<8x128xf32>
    %18 = arith.maximumf %15, %17 : vector<8x128xf32>
    %c0_12 = arith.constant 0 : index
    %c0_13 = arith.constant 0 : index
    %19 = vector.load %arg6[%c0_12, %c0_13] : memref<1x128xf32, #tpu.memory_space<vmem>>, vector<1x128xf32>
    %20 = vector.broadcast %19 : vector<1x128xf32> to vector<8x128xf32>
    %21 = arith.mulf %18, %20 : vector<8x128xf32>
    %cst_14 = arith.constant dense<0.000000e+00> : vector<8xf32>
    %22 = vector.multi_reduction <add>, %21, %cst_14 [1] : vector<8x128xf32> to vector<8xf32>
    %23 = vector.shape_cast %22 : vector<8xf32> to vector<8x1xf32>
    %c0_15 = arith.constant 0 : index
    %c0_16 = arith.constant 0 : index
    %24 = memref.load %arg7[%c0_15, %c0_16] : memref<1x1xf32, #tpu.memory_space<smem>>
    %25 = vector.broadcast %24 : f32 to vector<8x1xf32>
    %26 = arith.addf %23, %25 : vector<8x1xf32>
    %27 = arith.negf %26 : vector<8x1xf32>
    %28 = math.exp %27 : vector<8x1xf32>
    %cst_17 = arith.constant 1.000000e+00 : f32
    %29 = vector.broadcast %cst_17 : f32 to vector<8x1xf32>
    %30 = arith.addf %29, %28 : vector<8x1xf32>
    %31 = arith.divf %29, %30 : vector<8x1xf32>
    %c0_18 = arith.constant 0 : index
    %c0_19 = arith.constant 0 : index
    %32 = vector.load %arg8[%c0_18, %c0_19] : memref<8x1xf32, #tpu.memory_space<vmem>>, vector<8x1xf32>
    tpu.vector_store %arg8[%c0_18, %c0_19], %31 {strides = array<i32>} : memref<8x1xf32, #tpu.memory_space<vmem>>, vector<8x1xf32>,
    return
  }
  func.func @transform_0(%arg0: i32) -> (i32, i32) {
    %c0_i32 = arith.constant 0 : i32
    %c0_i32_0 = arith.constant 0 : i32
    return %arg0, %c0_i32 : i32, i32
  }
  func.func @transform_1(%arg0: i32) -> (i32, i32) {
    %c0_i32 = arith.constant 0 : i32
    %c0_i32_0 = arith.constant 0 : i32
    %c0_i32_1 = arith.constant 0 : i32
    return %c0_i32, %c0_i32_0 : i32, i32
  }
  func.func @transform_2(%arg0: i32) -> (i32, i32) {
    %c0_i32 = arith.constant 0 : i32
    %c0_i32_0 = arith.constant 0 : i32
    %c0_i32_1 = arith.constant 0 : i32
    return %c0_i32, %c0_i32_0 : i32, i32
  }
  func.func @transform_3(%arg0: i32) -> (i32, i32) {
    %c0_i32 = arith.constant 0 : i32
    %c0_i32_0 = arith.constant 0 : i32
    %c0_i32_1 = arith.constant 0 : i32
    return %c0_i32, %c0_i32_0 : i32, i32
  }
  func.func @transform_4(%arg0: i32) -> (i32, i32) {
    %c0_i32 = arith.constant 0 : i32
    %c0_i32_0 = arith.constant 0 : i32
    %c0_i32_1 = arith.constant 0 : i32
    return %c0_i32, %c0_i32_0 : i32, i32
  }
  func.func @transform_5(%arg0: i32) -> (i32, i32) {
    %c0_i32 = arith.constant 0 : i32
    %c0_i32_0 = arith.constant 0 : i32
    %c0_i32_1 = arith.constant 0 : i32
    return %c0_i32, %c0_i32_0 : i32, i32
  }
  func.func @transform_6(%arg0: i32) -> (i32, i32) {
    %c0_i32 = arith.constant 0 : i32
    %c0_i32_0 = arith.constant 0 : i32
    %c0_i32_1 = arith.constant 0 : i32
    return %c0_i32, %c0_i32_0 : i32, i32
  }
  func.func @transform_7(%arg0: i32) -> (i32, i32) {
    %c0_i32 = arith.constant 0 : i32
    %c0_i32_0 = arith.constant 0 : i32
    return %arg0, %c0_i32 : i32, i32
  }
}

</mosaic_0001>

<bundles_post_ra>
// kernel: tpu_custom_call.1
= control target key start
LH: loop header
LB: loop body
LE: loop exit
PB: predicated region body
PF: predicated region fallthrough
CT: control target
= control target key end

     0   :  { %13 = vsyncpa [#allocation4], 0  ;;  %s529_s0 = inlined_call_operand.hbm [shape: f32[8,32], index: 0, kind: input, shape index: {}]   ;;  %s530_s1 = inlined_call_operand.hbm [shape: bf16[32,128], index: 1, kind: input, shape index: {}]   ;;  %s531_s2 = inlined_call_operand.vmem [shape: f32[1,128], index: 2, kind: input, shape index: {}]   ;;  %s532_s3 = inlined_call_operand.hbm [shape: bf16[128,128], index: 3, kind: input, shape index: {}]   ;;  %s533_s4 = inlined_call_operand.vmem [shape: f32[1,128], index: 4, kind: input, shape index: {}]   ;;  %s534_s5 = inlined_call_operand.vmem [shape: f32[1,128], index: 5, kind: input, shape index: {}]   ;;  %s535_s6 = inlined_call_operand.<no memory space> [shape: f32[1,1], index: 6, kind: input, shape index: {}]   ;;  %s536_s7 = inlined_call_operand.vmem [shape: f32[8,1], index: 7, kind: output, shape index: {}]  }
   0x1   :  { %14 = vsyncpa [#allocation6], 0  ;;  %s425_s24 = smov [#allocation5]   ;;  %s355_s28 = scalar_lea.hbm %s530_s1, 256 }
   0x2   :  { %s30_s25 = sshll.u32 %s425_s24, 4  ;;  %p356_p0 = scmp.ne.s32.totalorder %s530_s1, %s355_s28  ;;  %s31_s25 = int_to_ptr.vmem [resolvable:$true] %s30_s25 }
   0x3   :  { %p359_p1 = scmp.lt.u32.totalorder %s355_s28, %s530_s1 }
   0x5   :  { %p361_p2 = pnand %p359_p1, %p356_p0 }
   0x7   :  { %364 = shalt.err (!%p361_p2)
}
   0x8   :  { %s365_s10 = scalar_lea.vmem %s31_s25, 256  ;;  %p370_p4 = scmp.lt.s32.totalorder %s31_s25, %s31_s25 }
   0x9   :  { %p366_p3 = scmp.ne.s32.totalorder %s31_s25, %s365_s10  ;;  %p371_p5 = scmp.lt.s32.totalorder %s365_s10, %s365_s10 }
   0xb   :  { %p372_p6 = por %p371_p5, %p370_p4 }
   0xd   :  { %p373_p7 = pnand %p372_p6, %p366_p3 }
   0xf   :  { %376 = shalt.err (!%p373_p7)
}
  0x10   :  { %s426_s11 = smov 64   ;;  %s427_s12 = smov 4  }
  0x11   :  { %36 = dma.hbm_to_vmem [thread:$0]  %s530_s1, 256, %s31_s25, [#allocation6], %s426_s11, %s426_s11, %s427_s12  }
  0x12   :  { %s428_s15 = smov [#allocation3]   ;;  %s429_s17 = smov [#allocation7]  }
  0x13   :  { %s21_s16 = sshll.u32 %s428_s15, 4  ;;  %s44_s18 = sshll.u32 %s429_s17, 4  ;;  %s22_s16 = int_to_ptr.vmem [resolvable:$true] %s21_s16  ;;  %s45_s18 = int_to_ptr.vmem [resolvable:$true] %s44_s18 }
  0x14   :  { %s377_s21 = scalar_lea.hbm %s529_s0, 128 }
  0x15   :  { %p378_p8 = scmp.ne.s32.totalorder %s529_s0, %s377_s21  ;;  %p381_p9 = scmp.lt.u32.totalorder %s377_s21, %s529_s0 }
  0x17   :  { %p383_p10 = pnand %p381_p9, %p378_p8 }
  0x19   :  { %386 = shalt.err (!%p383_p10)
}
  0x1a   :  { %s387_s1 = scalar_lea.vmem %s22_s16, 128  ;;  %p392_p12 = scmp.lt.s32.totalorder %s22_s16, %s22_s16 }
  0x1b   :  { %p388_p11 = scmp.ne.s32.totalorder %s22_s16, %s387_s1  ;;  %p393_p13 = scmp.lt.s32.totalorder %s387_s1, %s387_s1 }
  0x1d   :  { %p394_p0 = por %p393_p13, %p392_p12 }
  0x1f   :  { %p395_p1 = pnand %p394_p0, %p388_p11 }
  0x21   :  { %398 = shalt.err (!%p395_p1)
}
  0x22   :  { %24 = dma.hbm_to_vmem [thread:$0]  %s529_s0, 128, %s22_s16, [#allocation4]  }
  0x23   :  { %s399_s30 = scalar_lea.hbm %s532_s3, 1024 }
  0x24   :  { %p400_p2 = scmp.ne.s32.totalorder %s532_s3, %s399_s30  ;;  %p403_p3 = scmp.lt.u32.totalorder %s399_s30, %s532_s3 }
  0x26   :  { %p405_p4 = pnand %p403_p3, %p400_p2 }
  0x28   :  { %408 = shalt.err (!%p405_p4)
}
  0x29   :  { %s409_s14 = scalar_lea.vmem %s45_s18, 1024  ;;  %p414_p6 = scmp.lt.s32.totalorder %s45_s18, %s45_s18 }
  0x2a   :  { %p410_p5 = scmp.ne.s32.totalorder %s45_s18, %s409_s14  ;;  %p415_p7 = scmp.lt.s32.totalorder %s409_s14, %s409_s14 }
  0x2c   :  { %p416_p8 = por %p415_p7, %p414_p6 }
  0x2e   :  { %p417_p9 = pnand %p416_p8, %p410_p5 }
  0x30   :  { %420 = shalt.err (!%p417_p9)
}
  0x31   :  { %50 = dma.hbm_to_vmem [thread:$0]  %s532_s3, 1024, %s45_s18, [#allocation6], %s426_s11, %s426_s11, %s427_s12  }
  0x32   :  { %421 = dma.done.wait [#allocation4], 128  }
  0x33   :  { %422 = vsyncadd [#allocation4], 4294967168 }
  0x34   :  { %423 = dma.done.wait [#allocation6], 1280  }
  0x35   :  { %424 = vsyncadd [#allocation6], 4294966016  ;;  %v430_v0 = vmov 0.0   ;;  %vm431_vm0 = vmmov 0   ;;  %v341_v1 = vld [vmem:[#allocation5] sm:$0xff]   ;;  %v342_v2 = vld [vmem:[#allocation5 + $0x8] sm:$0xff]   ;;  %v263_v32 = vstv %s535_s6 }
  0x36   :  { %306 = vmatprep.subr.bf16.mxu0 %v430_v0  ;;  %310 = vmatprep.mubr.msk.bf16.mxu0 %vm431_vm0, %v430_v0  ;;  %v67_v3 = vld [vmem:[#allocation3] sm:$0xff]  ;;  %v343_v4 = vld [vmem:[#allocation7] sm:$0xff]   ;;  %vm92_vm1 = vcmask 261120   ;;  %v345_v7 = vld [vmem:[#allocation7 + $0x10] sm:$0xff]   ;;  %vm271_vm2 = vcmask 7168  }
  0x37   :  { %314 = vmatprep.subr.bf16.mxu1 %v430_v0  ;;  %330 = vmatprep.mubr.msk.bf16.mxu1 %vm431_vm0, %v430_v0  ;;  %v68_v5 = vpack.c.bf16 %v67_v3, %v67_v3  ;;  %v344_v6 = vld [vmem:[#allocation7 + $0x8] sm:$0xff]   ;;  %v346_v8 = vld [vmem:[#allocation7 + $0x18] sm:$0xff]   ;;  %v347_v9 = vld [vmem:[#allocation7 + $0x20] sm:$0xff]  }
  0x38   :  { %307 = vmatpush3.bf16.msra.mxu0 %v341_v1  ;;  %315 = vmatpush3.bf16.msra.mxu1 %v343_v4  ;;  %v348_v10 = vld [vmem:[#allocation7 + $0x28] sm:$0xff]   ;;  %v349_v11 = vld [vmem:[#allocation7 + $0x30] sm:$0xff]   ;;  %v350_v12 = vld [vmem:[#allocation7 + $0x38] sm:$0xff]  }
  0x39   :  { %308 = vmatprep.subr.bf16.mxu0 %v430_v0  ;;  %316 = vmatprep.subr.bf16.mxu1 %v430_v0  ;;  %v279_v13 = vld [vmem:[%s531_s2] ss:$0 sm:$0xff] }
  0x3a   :  { %v283_v22 = vld [vmem:[%s533_s4] ss:$0 sm:$0xff] }
  0x3b   :  { %v292_v29 = vld [vmem:[%s534_s5] ss:$0 sm:$0xff] }
  0x3c   :  { %309 = vmatpush3.bf16.msra.mxu0 %v342_v2  ;;  %317 = vmatpush3.bf16.msra.mxu1 %v344_v6 }
  0x3d   :  { %318 = vmatprep.subr.bf16.mxu1 %v430_v0 }
  0x3f   :  { %311 = vmatmul.mubr.msk.bf16.vlgmr.msra.gmra.mrb[0].mxu0 %vm92_vm1, %v68_v5 }
  0x40   :  { %319 = vmatpush3.bf16.msra.mxu1 %v345_v7 }
  0x41   :  { %320 = vmatprep.subr.bf16.mxu1 %v430_v0 }
  0x44   :  { %321 = vmatpush3.bf16.msra.mxu1 %v346_v8 }
  0x45   :  { %322 = vmatprep.subr.bf16.mxu1 %v430_v0 }
  0x48   :  { %323 = vmatpush3.bf16.msra.mxu1 %v347_v9 }
  0x49   :  { %324 = vmatprep.subr.bf16.mxu1 %v430_v0 }
  0x4c   :  { %325 = vmatpush3.bf16.msra.mxu1 %v348_v10 }
  0x4d   :  { %326 = vmatprep.subr.bf16.mxu1 %v430_v0 }
  0x50   :  { %327 = vmatpush3.bf16.msra.mxu1 %v349_v11 }
  0x51   :  { %328 = vmatprep.subr.bf16.mxu1 %v430_v0 }
  0x54   :  { %329 = vmatpush3.bf16.msra.mxu1 %v350_v12 }
 0x112   :  { %v130_v14 = vpop.f32.mrb[0].mxu0 }
 0x113   :  { %v131_v15 = vadd.f32 %v279_v13, %v130_v14  ;;  %v312_v16 = vpop.f32.mrb[1].mxu0 }
 0x114   :  { %v133_v17 = vpop.f32.mrb[2].mxu0 }
 0x115   :  { %v136_v18 = vmul.f32 0.2, %v131_v15  ;;  %v313_v19 = vpop.f32.mrb[3].mxu0 }
 0x117   :  { %v137_v20 = vmax.f32 %v131_v15, %v136_v18 }
 0x119   :  { %v138_v21 = vpack.c.bf16 %v137_v20, %v137_v20 }
 0x11b   :  { %331 = vmatmul.mubr.bf16.vlgmr.msra.gmra.mrb[0].mxu1 %v138_v21 }
 0x1ee   :  { %v244_v23 = vpop.f32.mrb[0].mxu1 }
 0x1ef   :  { %v245_v24 = vadd.f32 %v283_v22, %v244_v23  ;;  %v332_v25 = vpop.f32.mrb[1].mxu1 }
 0x1f0   :  { %v247_v26 = vpop.f32.mrb[2].mxu1 }
 0x1f1   :  { %v250_v27 = vmul.f32 0.2, %v245_v24  ;;  %v333_v28 = vpop.f32.mrb[3].mxu1 }
 0x1f3   :  { %v251_v30 = vmax.f32 %v245_v24, %v250_v27 }
 0x1f5   :  { %v259_v31 = vmul.f32 %v292_v29, %v251_v30 }
 0x1f7   :  { %260 = vadd.xlane.f32.xlu0 %v259_v31 }
 0x284   :  { %v261_v33 = vpop.xlane.xlu0 %260 }
 0x285   :  { %v264_v34 = vadd.f32 %v263_v32, %v261_v33 }
 0x287   :  { %v293_v35 = vmul.f32 -1.442695, %v264_v34 }
 0x289   :  { %351 = vpow2.f32 %v293_v35 }
 0x293   :  { %v352_v36 = vpop.eup %351 }
 0x294   :  { %v268_v37 = vadd.f32 1.0, %v352_v36 }
 0x296   :  { %353 = vrcp.f32 %v268_v37 }
 0x2a0   :  { %v354_v38 = vpop.eup %353 }
 0x2a1   :  { %272 = vst.msk [vmem:[%s536_s7] sm:$0xff] %vm271_vm2, %v354_v38 }
 0x2a2   :  { %277 = vsyncpa [#allocation4], 1 }
 0x2a3   :  { %278 = vsyncpa [#allocation6], 1 }

</bundles_post_ra>
